<compile_context>
chip_gen: v5e
topology: v5e:2x2
jax: 0.10.0
libtpu: 0.0.40
codegen_flags: <defaults>
</compile_context>

<pallas_src>
import functools

import jax
import jax.numpy as jnp
from jax import lax
from jax.experimental import pallas as pl
from jax.experimental.pallas import tpu as pltpu

BN_EPS = 1e-5
LANE = 128


def _gine_block_kernel(node_ref, edge_ref, s_ref, dt_ref,
                       w_app_ref, b_app_ref, w_edge_ref, b_edge_ref,
                       gamma_ref, beta_ref, out_ref, *, n_layers):
    # Per-graph blocks (leading batch dim squeezed away by the BlockSpec).
    h = node_ref[...].astype(jnp.float32)      # (N, Hp)  f32 working copy
    e = edge_ref[...].astype(jnp.float32)      # (E, Hp)
    S = s_ref[...]                             # (E, N)   bf16 one-hot of edge src
    Dt = dt_ref[...]                           # (N, E)   bf16 one-hot^T of edge dst
    init = h

    def gine_conv(h, e, l):
        # gather source node features per edge (MXU, bf16 operands / f32 accum)
        h_src = jnp.dot(S, h.astype(jnp.bfloat16),
                        preferred_element_type=jnp.float32)             # (E, Hp)
        msg = jnp.maximum(h_src + e, 0.0)                                # ReLU message (f32)
        # scatter-add messages to destination nodes (MXU)
        aggr = jnp.dot(Dt, msg.astype(jnp.bfloat16),
                       preferred_element_type=jnp.float32)               # (N, Hp)
        z = h + aggr                                                     # (1 + eps) = 1
        z = jnp.dot(z.astype(jnp.bfloat16), w_app_ref[l],
                    preferred_element_type=jnp.float32) + b_app_ref[l]
        return jnp.maximum(z, 0.0)                                       # apply_func = Linear+ReLU

    for l in range(n_layers):
        h = gine_conv(h, e, l)
        # edge MLP: Linear + ReLU (bf16 MXU / f32 accum)
        e = jnp.maximum(
            jnp.dot(e.astype(jnp.bfloat16), w_edge_ref[l],
                    preferred_element_type=jnp.float32) + b_edge_ref[l],
            0.0)
        # dropout: eval mode -> identity
        # BatchNorm1d over the graph's nodes (training-mode batch stats, biased variance)
        mean = jnp.mean(h, axis=0, keepdims=True)
        var = jnp.mean((h - mean) ** 2, axis=0, keepdims=True)
        h = (h - mean) * lax.rsqrt(var + BN_EPS) * gamma_ref[l] + beta_ref[l]

    # module applies self.layers[-1] one extra time after the loop
    h = gine_conv(h, e, n_layers - 1)
    out_ref[...] = (h + init).astype(out_ref.dtype)


def gine_encoder_block(node_feat, edge_feat, src_onehot, dst_onehot_t,
                       w_app, b_app, w_edge, b_edge, gamma, beta):
    """node_feat (B,N,H), edge_feat (B,E,H), src_onehot (B,E,N), dst_onehot_t (B,N,E),
    per-layer params stacked on a leading L axis. Returns (B,N,H) f32."""
    B, N, H = node_feat.shape
    E = edge_feat.shape[1]
    L = w_app.shape[0]
    Hp = ((H + LANE - 1) // LANE) * LANE
    pad = Hp - H

    # --- lane-dense padding of the hidden axis (zeros; gamma padded with 1) ---
    nf = jnp.pad(node_feat.astype(jnp.float32), ((0, 0), (0, 0), (0, pad)))
    ef = jnp.pad(edge_feat.astype(jnp.float32), ((0, 0), (0, 0), (0, pad)))
    wa = jnp.pad(w_app, ((0, 0), (0, pad), (0, pad))).astype(jnp.bfloat16)
    we = jnp.pad(w_edge, ((0, 0), (0, pad), (0, pad))).astype(jnp.bfloat16)
    ba = jnp.pad(b_app, ((0, 0), (0, 0), (0, pad))).astype(jnp.float32)
    be = jnp.pad(b_edge, ((0, 0), (0, 0), (0, pad))).astype(jnp.float32)
    ga = jnp.pad(gamma, ((0, 0), (0, 0), (0, pad)), constant_values=1.0).astype(jnp.float32)
    bt = jnp.pad(beta, ((0, 0), (0, 0), (0, pad))).astype(jnp.float32)
    # bf16 one-hot incidence (0/1 exact in bf16; MXU fast path on v5e/v6e/v7x)
    S = src_onehot.astype(jnp.bfloat16)
    Dt = dst_onehot_t.astype(jnp.bfloat16)

    kernel = functools.partial(_gine_block_kernel, n_layers=L)

    # --- BlockSpecs: per-graph blocks (squeezed batch dim), shared params resident ---
    in_specs = [
        pl.BlockSpec((None, N, Hp), lambda b: (b, 0, 0)),   # node_feat
        pl.BlockSpec((None, E, Hp), lambda b: (b, 0, 0)),   # edge_feat
        pl.BlockSpec((None, E, N), lambda b: (b, 0, 0)),    # S
        pl.BlockSpec((None, N, E), lambda b: (b, 0, 0)),    # Dt
        pl.BlockSpec((L, Hp, Hp), lambda b: (0, 0, 0)),     # w_app  (shared, DMA'd once)
        pl.BlockSpec((L, 1, Hp), lambda b: (0, 0, 0)),      # b_app
        pl.BlockSpec((L, Hp, Hp), lambda b: (0, 0, 0)),     # w_edge
        pl.BlockSpec((L, 1, Hp), lambda b: (0, 0, 0)),      # b_edge
        pl.BlockSpec((L, 1, Hp), lambda b: (0, 0, 0)),      # gamma
        pl.BlockSpec((L, 1, Hp), lambda b: (0, 0, 0)),      # beta
    ]
    out_specs = pl.BlockSpec((None, N, Hp), lambda b: (b, 0, 0))

    # --- VMEM budget sized from the actual block footprint (double-buffered) ---
    per_graph_bytes = N * Hp * 4 + E * Hp * 4 + E * N * 2 + N * E * 2 + N * Hp * 4
    shared_bytes = 2 * L * Hp * Hp * 2 + 4 * L * Hp * 4
    vmem_limit = int(min(64 << 20, max(4 * per_graph_bytes + 2 * shared_bytes + (4 << 20),
                                       8 << 20)))

    # --- advisory cost estimate ---
    conv_flops = 2 * E * N * Hp + 2 * N * E * Hp + 2 * N * Hp * Hp
    edge_flops = 2 * E * Hp * Hp
    flops = B * ((L + 1) * conv_flops + L * edge_flops)
    bytes_accessed = (nf.size * 4 + ef.size * 4 + S.size * 2 + Dt.size * 2
                      + wa.size * 2 + we.size * 2
                      + (ba.size + be.size + ga.size + bt.size) * 4
                      + B * N * Hp * 4)
    cost = pl.CostEstimate(flops=int(flops), transcendentals=int(B * L * Hp),
                           bytes_accessed=int(bytes_accessed))

    out_padded = pl.pallas_call(
        kernel,
        out_shape=jax.ShapeDtypeStruct((B, N, Hp), jnp.float32),
        grid=(B,),
        in_specs=in_specs,
        out_specs=out_specs,
        compiler_params=pltpu.CompilerParams(
            dimension_semantics=("parallel",),      # graphs are independent -> both TCs on v7x
            vmem_limit_bytes=vmem_limit),
        cost_estimate=cost,
    )(nf, ef, S, Dt, wa, ba, we, be, ga, bt)

    return out_padded[:, :, :H]


def reference_single(node_feat, edge_feat, S, Dt, w_app, b_app, w_edge, b_edge,
                     gamma, beta, emulate_bf16=False):
    """Pure-JAX reference of the same forward for one graph (unpadded H).
    With emulate_bf16=True the matmul operands are rounded to bf16 exactly as the
    kernel does (accumulation stays f32), for a tight numerical comparison."""
    if emulate_bf16:
        q = lambda x: x.astype(jnp.bfloat16).astype(jnp.float32)
    else:
        q = lambda x: x
    h, e = node_feat, edge_feat
    init = h
    L = w_app.shape[0]

    def conv(h, e, l):
        h_src = jnp.dot(q(S), q(h), preferred_element_type=jnp.float32)
        msg = jnp.maximum(h_src + e, 0.0)
        aggr = jnp.dot(q(Dt), q(msg), preferred_element_type=jnp.float32)
        z = jnp.dot(q(h + aggr), q(w_app[l]), preferred_element_type=jnp.float32) + b_app[l]
        return jnp.maximum(z, 0.0)

    for l in range(L):
        h = conv(h, e, l)
        e = jnp.maximum(
            jnp.dot(q(e), q(w_edge[l]), preferred_element_type=jnp.float32) + b_edge[l], 0.0)
        mean = h.mean(0, keepdims=True)
        var = ((h - mean) ** 2).mean(0, keepdims=True)
        h = (h - mean) * lax.rsqrt(var + BN_EPS) * gamma[l] + beta[l]
    h = conv(h, e, L - 1)
    return h + init


if __name__ == "__main__":
    # Small, deterministic problem: batch of B independent graphs, hidden_dim = 32,
    # n_layers = 2, each graph with N = 8 nodes and E = 16 directed edges.
    B = 4
    hidden_dim = 32
    n_layers = 2
    n_nodes = 8
    n_edges = 16

    key = jax.random.PRNGKey(0)
    (k_node, k_edge, k_src, k_dst, k_wa, k_ba, k_we, k_be, k_g, k_b) = jax.random.split(key, 10)

    node_feat = jax.random.normal(k_node, (B, n_nodes, hidden_dim), dtype=jnp.float32)
    edge_feat = jax.random.normal(k_edge, (B, n_edges, hidden_dim), dtype=jnp.float32)

    src = jax.random.randint(k_src, (B, n_edges), 0, n_nodes)
    dst = jax.random.randint(k_dst, (B, n_edges), 0, n_nodes)
    # one-hot incidence matrices (glue, built outside the kernel)
    src_onehot = jax.nn.one_hot(src, n_nodes, dtype=jnp.float32)                       # (B, E, N)
    dst_onehot_t = jnp.swapaxes(jax.nn.one_hot(dst, n_nodes, dtype=jnp.float32), -1, -2)  # (B, N, E)

    # Deterministic synthetic parameters (per-layer, stacked on leading axis, shared across graphs).
    scale = 1.0 / jnp.sqrt(jnp.float32(hidden_dim))
    w_app = jax.random.normal(k_wa, (n_layers, hidden_dim, hidden_dim), jnp.float32) * scale
    b_app = jax.random.normal(k_ba, (n_layers, 1, hidden_dim), jnp.float32) * 0.1
    w_edge = jax.random.normal(k_we, (n_layers, hidden_dim, hidden_dim), jnp.float32) * scale
    b_edge = jax.random.normal(k_be, (n_layers, 1, hidden_dim), jnp.float32) * 0.1
    gamma = 1.0 + 0.1 * jax.random.normal(k_g, (n_layers, 1, hidden_dim), jnp.float32)
    beta = 0.1 * jax.random.normal(k_b, (n_layers, 1, hidden_dim), jnp.float32)

    out = gine_encoder_block(node_feat, edge_feat, src_onehot, dst_onehot_t,
                             w_app, b_app, w_edge, b_edge, gamma, beta)
    out = jax.block_until_ready(out)
    assert out.shape == (B, n_nodes, hidden_dim)

    # Tight check against a bf16-operand-emulating reference (same numerics as the kernel).
    ref_bf16 = jax.vmap(
        lambda nf, ef, S, Dt: reference_single(nf, ef, S, Dt, w_app, b_app, w_edge, b_edge,
                                               gamma, beta, emulate_bf16=True)
    )(node_feat, edge_feat, src_onehot, dst_onehot_t)
    assert jnp.allclose(out, ref_bf16, rtol=2e-3, atol=2e-3), \
        "Pallas kernel mismatch vs bf16-emulating JAX reference"

    # Loose check against the pure-f32 reference (quantization error bound).
    ref_f32 = jax.vmap(
        lambda nf, ef, S, Dt: reference_single(nf, ef, S, Dt, w_app, b_app, w_edge, b_edge,
                                               gamma, beta, emulate_bf16=False)
    )(node_feat, edge_feat, src_onehot, dst_onehot_t)
    assert jnp.allclose(out, ref_f32, rtol=1e-1, atol=1e-1), \
        "Pallas kernel deviates too far from f32 reference"

    print("KERNEL_OK")
</pallas_src>

<mosaic_0001>
module attributes {stable_mosaic.version = 11 : i64} {
  func.func @_gine_block_kernel(%arg0: i32, %arg1: memref<1x8x128xf32, #tpu.memory_space<vmem>>, %arg2: memref<1x16x128xf32, #tpu.memory_space<vmem>>, %arg3: memref<1x16x8xbf16, #tpu.memory_space<vmem>>, %arg4: memref<1x8x16xbf16, #tpu.memory_space<vmem>>, %arg5: memref<2x128x128xbf16, #tpu.memory_space<vmem>>, %arg6: memref<2x1x128xf32, #tpu.memory_space<vmem>>, %arg7: memref<2x128x128xbf16, #tpu.memory_space<vmem>>, %arg8: memref<2x1x128xf32, #tpu.memory_space<vmem>>, %arg9: memref<2x1x128xf32, #tpu.memory_space<vmem>>, %arg10: memref<2x1x128xf32, #tpu.memory_space<vmem>>, %arg11: memref<1x8x128xf32, #tpu.memory_space<vmem>>) attributes {dimension_semantics = [#tpu.dimension_semantics<parallel>], iteration_bounds = array<i64: 4>, scalar_prefetch = 0 : i64, scratch_operands = 0 : i64, tpu.core_type = #tpu.core_type<tc>, window_params = [{transform_indices = @transform_0, window_bounds = array<i64: 1, 8, 128>}, {transform_indices = @transform_1, window_bounds = array<i64: 1, 16, 128>}, {transform_indices = @transform_2, window_bounds = array<i64: 1, 16, 8>}, {transform_indices = @transform_3, window_bounds = array<i64: 1, 8, 16>}, {pipeline_mode = #tpu.pipeline_mode<synchronous>, transform_indices = @transform_4, window_bounds = array<i64: 2, 128, 128>}, {pipeline_mode = #tpu.pipeline_mode<synchronous>, transform_indices = @transform_5, window_bounds = array<i64: 2, 1, 128>}, {pipeline_mode = #tpu.pipeline_mode<synchronous>, transform_indices = @transform_6, window_bounds = array<i64: 2, 128, 128>}, {pipeline_mode = #tpu.pipeline_mode<synchronous>, transform_indices = @transform_7, window_bounds = array<i64: 2, 1, 128>}, {pipeline_mode = #tpu.pipeline_mode<synchronous>, transform_indices = @transform_8, window_bounds = array<i64: 2, 1, 128>}, {pipeline_mode = #tpu.pipeline_mode<synchronous>, transform_indices = @transform_9, window_bounds = array<i64: 2, 1, 128>}, {transform_indices = @transform_10, window_bounds = array<i64: 1, 8, 128>}]} {
    %c0 = arith.constant 0 : index
    %c0_0 = arith.constant 0 : index
    %c0_1 = arith.constant 0 : index
    %0 = vector.load %arg1[%c0, %c0_0, %c0_1] : memref<1x8x128xf32, #tpu.memory_space<vmem>>, vector<1x8x128xf32>
    %1 = vector.shape_cast %0 : vector<1x8x128xf32> to vector<8x128xf32>
    %c0_2 = arith.constant 0 : index
    %c0_3 = arith.constant 0 : index
    %c0_4 = arith.constant 0 : index
    %2 = vector.load %arg2[%c0_2, %c0_3, %c0_4] : memref<1x16x128xf32, #tpu.memory_space<vmem>>, vector<1x16x128xf32>
    %3 = vector.shape_cast %2 : vector<1x16x128xf32> to vector<16x128xf32>
    %c0_5 = arith.constant 0 : index
    %c0_6 = arith.constant 0 : index
    %c0_7 = arith.constant 0 : index
    %4 = vector.load %arg3[%c0_5, %c0_6, %c0_7] : memref<1x16x8xbf16, #tpu.memory_space<vmem>>, vector<1x16x8xbf16>
    %5 = vector.shape_cast %4 : vector<1x16x8xbf16> to vector<16x8xbf16>
    %c0_8 = arith.constant 0 : index
    %c0_9 = arith.constant 0 : index
    %c0_10 = arith.constant 0 : index
    %6 = vector.load %arg4[%c0_8, %c0_9, %c0_10] : memref<1x8x16xbf16, #tpu.memory_space<vmem>>, vector<1x8x16xbf16>
    %7 = vector.shape_cast %6 : vector<1x8x16xbf16> to vector<8x16xbf16>
    %8 = arith.truncf %1 : vector<8x128xf32> to vector<8x128xbf16>
    %cst = arith.constant dense<0.000000e+00> : vector<16x128xf32>
    %9 = tpu.matmul %5, %8, %cst {dimension_numbers = #tpu.dot_dimension_numbers<[1], [0], [0], [1], [0, 0, 1, 1], [], []>} : vector<16x8xbf16>, vector<8x128xbf16>, vector<16x128xf32> -> vector<16x128xf32>
    %10 = arith.addf %9, %3 : vector<16x128xf32>
    %cst_11 = arith.constant 0.000000e+00 : f32
    %11 = vector.broadcast %cst_11 : f32 to vector<16x128xf32>
    %12 = arith.maximumf %10, %11 : vector<16x128xf32>
    %13 = arith.truncf %12 : vector<16x128xf32> to vector<16x128xbf16>
    %cst_12 = arith.constant dense<0.000000e+00> : vector<8x128xf32>
    %14 = tpu.matmul %7, %13, %cst_12 {dimension_numbers = #tpu.dot_dimension_numbers<[1], [0], [0], [1], [0, 0, 1, 1], [], []>} : vector<8x16xbf16>, vector<16x128xbf16>, vector<8x128xf32> -> vector<8x128xf32>
    %15 = arith.addf %1, %14 : vector<8x128xf32>
    %16 = arith.truncf %15 : vector<8x128xf32> to vector<8x128xbf16>
    %c0_13 = arith.constant 0 : index
    %c0_14 = arith.constant 0 : index
    %c0_15 = arith.constant 0 : index
    %17 = vector.load %arg5[%c0_13, %c0_14, %c0_15] : memref<2x128x128xbf16, #tpu.memory_space<vmem>>, vector<1x128x128xbf16>
    %18 = vector.shape_cast %17 : vector<1x128x128xbf16> to vector<128x128xbf16>
    %cst_16 = arith.constant dense<0.000000e+00> : vector<8x128xf32>
    %19 = tpu.matmul %16, %18, %cst_16 {dimension_numbers = #tpu.dot_dimension_numbers<[1], [0], [0], [1], [0, 0, 1, 1], [], []>} : vector<8x128xbf16>, vector<128x128xbf16>, vector<8x128xf32> -> vector<8x128xf32>
    %c0_17 = arith.constant 0 : index
    %c0_18 = arith.constant 0 : index
    %c0_19 = arith.constant 0 : index
    %20 = vector.load %arg6[%c0_17, %c0_18, %c0_19] : memref<2x1x128xf32, #tpu.memory_space<vmem>>, vector<1x1x128xf32>
    %21 = vector.shape_cast %20 : vector<1x1x128xf32> to vector<1x128xf32>
    %22 = vector.broadcast %21 : vector<1x128xf32> to vector<8x128xf32>
    %23 = arith.addf %19, %22 : vector<8x128xf32>
    %cst_20 = arith.constant 0.000000e+00 : f32
    %24 = vector.broadcast %cst_20 : f32 to vector<8x128xf32>
    %25 = arith.maximumf %23, %24 : vector<8x128xf32>
    %26 = arith.truncf %3 : vector<16x128xf32> to vector<16x128xbf16>
    %c0_21 = arith.constant 0 : index
    %c0_22 = arith.constant 0 : index
    %c0_23 = arith.constant 0 : index
    %27 = vector.load %arg7[%c0_21, %c0_22, %c0_23] : memref<2x128x128xbf16, #tpu.memory_space<vmem>>, vector<1x128x128xbf16>
    %28 = vector.shape_cast %27 : vector<1x128x128xbf16> to vector<128x128xbf16>
    %cst_24 = arith.constant dense<0.000000e+00> : vector<16x128xf32>
    %29 = tpu.matmul %26, %28, %cst_24 {dimension_numbers = #tpu.dot_dimension_numbers<[1], [0], [0], [1], [0, 0, 1, 1], [], []>} : vector<16x128xbf16>, vector<128x128xbf16>, vector<16x128xf32> -> vector<16x128xf32>
    %c0_25 = arith.constant 0 : index
    %c0_26 = arith.constant 0 : index
    %c0_27 = arith.constant 0 : index
    %30 = vector.load %arg8[%c0_25, %c0_26, %c0_27] : memref<2x1x128xf32, #tpu.memory_space<vmem>>, vector<1x1x128xf32>
    %31 = vector.shape_cast %30 : vector<1x1x128xf32> to vector<1x128xf32>
    %32 = vector.broadcast %31 : vector<1x128xf32> to vector<16x128xf32>
    %33 = arith.addf %29, %32 : vector<16x128xf32>
    %cst_28 = arith.constant 0.000000e+00 : f32
    %34 = vector.broadcast %cst_28 : f32 to vector<16x128xf32>
    %35 = arith.maximumf %33, %34 : vector<16x128xf32>
    %cst_29 = arith.constant dense<0.000000e+00> : vector<128xf32>
    %36 = vector.multi_reduction <add>, %25, %cst_29 [0] : vector<8x128xf32> to vector<128xf32>
    %37 = vector.shape_cast %36 : vector<128xf32> to vector<1x128xf32>
    %cst_30 = arith.constant 8.000000e+00 : f32
    %38 = vector.broadcast %cst_30 : f32 to vector<1x128xf32>
    %39 = arith.divf %37, %38 : vector<1x128xf32>
    %40 = vector.broadcast %39 : vector<1x128xf32> to vector<8x128xf32>
    %41 = arith.subf %25, %40 : vector<8x128xf32>
    %42 = arith.mulf %41, %41 : vector<8x128xf32>
    %cst_31 = arith.constant dense<0.000000e+00> : vector<128xf32>
    %43 = vector.multi_reduction <add>, %42, %cst_31 [0] : vector<8x128xf32> to vector<128xf32>
    %44 = vector.shape_cast %43 : vector<128xf32> to vector<1x128xf32>
    %cst_32 = arith.constant 8.000000e+00 : f32
    %45 = vector.broadcast %cst_32 : f32 to vector<1x128xf32>
    %46 = arith.divf %44, %45 : vector<1x128xf32>
    %47 = vector.broadcast %39 : vector<1x128xf32> to vector<8x128xf32>
    %48 = arith.subf %25, %47 : vector<8x128xf32>
    %cst_33 = arith.constant 9.99999974E-6 : f32
    %49 = vector.broadcast %cst_33 : f32 to vector<1x128xf32>
    %50 = arith.addf %46, %49 : vector<1x128xf32>
    %51 = math.rsqrt %50 : vector<1x128xf32>
    %52 = vector.broadcast %51 : vector<1x128xf32> to vector<8x128xf32>
    %53 = arith.mulf %48, %52 : vector<8x128xf32>
    %c0_34 = arith.constant 0 : index
    %c0_35 = arith.constant 0 : index
    %c0_36 = arith.constant 0 : index
    %54 = vector.load %arg9[%c0_34, %c0_35, %c0_36] : memref<2x1x128xf32, #tpu.memory_space<vmem>>, vector<1x1x128xf32>
    %55 = vector.shape_cast %54 : vector<1x1x128xf32> to vector<1x128xf32>
    %56 = vector.broadcast %55 : vector<1x128xf32> to vector<8x128xf32>
    %57 = arith.mulf %53, %56 : vector<8x128xf32>
    %c0_37 = arith.constant 0 : index
    %c0_38 = arith.constant 0 : index
    %c0_39 = arith.constant 0 : index
    %58 = vector.load %arg10[%c0_37, %c0_38, %c0_39] : memref<2x1x128xf32, #tpu.memory_space<vmem>>, vector<1x1x128xf32>
    %59 = vector.shape_cast %58 : vector<1x1x128xf32> to vector<1x128xf32>
    %60 = vector.broadcast %59 : vector<1x128xf32> to vector<8x128xf32>
    %61 = arith.addf %57, %60 : vector<8x128xf32>
    %62 = arith.truncf %61 : vector<8x128xf32> to vector<8x128xbf16>
    %cst_40 = arith.constant dense<0.000000e+00> : vector<16x128xf32>
    %63 = tpu.matmul %5, %62, %cst_40 {dimension_numbers = #tpu.dot_dimension_numbers<[1], [0], [0], [1], [0, 0, 1, 1], [], []>} : vector<16x8xbf16>, vector<8x128xbf16>, vector<16x128xf32> -> vector<16x128xf32>
    %64 = arith.addf %63, %35 : vector<16x128xf32>
    %cst_41 = arith.constant 0.000000e+00 : f32
    %65 = vector.broadcast %cst_41 : f32 to vector<16x128xf32>
    %66 = arith.maximumf %64, %65 : vector<16x128xf32>
    %67 = arith.truncf %66 : vector<16x128xf32> to vector<16x128xbf16>
    %cst_42 = arith.constant dense<0.000000e+00> : vector<8x128xf32>
    %68 = tpu.matmul %7, %67, %cst_42 {dimension_numbers = #tpu.dot_dimension_numbers<[1], [0], [0], [1], [0, 0, 1, 1], [], []>} : vector<8x16xbf16>, vector<16x128xbf16>, vector<8x128xf32> -> vector<8x128xf32>
    %69 = arith.addf %61, %68 : vector<8x128xf32>
    %70 = arith.truncf %69 : vector<8x128xf32> to vector<8x128xbf16>
    %c1 = arith.constant 1 : index
    %c0_43 = arith.constant 0 : index
    %c0_44 = arith.constant 0 : index
    %71 = vector.load %arg5[%c1, %c0_43, %c0_44] : memref<2x128x128xbf16, #tpu.memory_space<vmem>>, vector<1x128x128xbf16>
    %72 = vector.shape_cast %71 : vector<1x128x128xbf16> to vector<128x128xbf16>
    %cst_45 = arith.constant dense<0.000000e+00> : vector<8x128xf32>
    %73 = tpu.matmul %70, %72, %cst_45 {dimension_numbers = #tpu.dot_dimension_numbers<[1], [0], [0], [1], [0, 0, 1, 1], [], []>} : vector<8x128xbf16>, vector<128x128xbf16>, vector<8x128xf32> -> vector<8x128xf32>
    %c1_46 = arith.constant 1 : index
    %c0_47 = arith.constant 0 : index
    %c0_48 = arith.constant 0 : index
    %74 = vector.load %arg6[%c1_46, %c0_47, %c0_48] : memref<2x1x128xf32, #tpu.memory_space<vmem>>, vector<1x1x128xf32>
    %75 = vector.shape_cast %74 : vector<1x1x128xf32> to vector<1x128xf32>
    %76 = vector.broadcast %75 : vector<1x128xf32> to vector<8x128xf32>
    %77 = arith.addf %73, %76 : vector<8x128xf32>
    %cst_49 = arith.constant 0.000000e+00 : f32
    %78 = vector.broadcast %cst_49 : f32 to vector<8x128xf32>
    %79 = arith.maximumf %77, %78 : vector<8x128xf32>
    %80 = arith.truncf %35 : vector<16x128xf32> to vector<16x128xbf16>
    %c1_50 = arith.constant 1 : index
    %c0_51 = arith.constant 0 : index
    %c0_52 = arith.constant 0 : index
    %81 = vector.load %arg7[%c1_50, %c0_51, %c0_52] : memref<2x128x128xbf16, #tpu.memory_space<vmem>>, vector<1x128x128xbf16>
    %82 = vector.shape_cast %81 : vector<1x128x128xbf16> to vector<128x128xbf16>
    %cst_53 = arith.constant dense<0.000000e+00> : vector<16x128xf32>
    %83 = tpu.matmul %80, %82, %cst_53 {dimension_numbers = #tpu.dot_dimension_numbers<[1], [0], [0], [1], [0, 0, 1, 1], [], []>} : vector<16x128xbf16>, vector<128x128xbf16>, vector<16x128xf32> -> vector<16x128xf32>
    %c1_54 = arith.constant 1 : index
    %c0_55 = arith.constant 0 : index
    %c0_56 = arith.constant 0 : index
    %84 = vector.load %arg8[%c1_54, %c0_55, %c0_56] : memref<2x1x128xf32, #tpu.memory_space<vmem>>, vector<1x1x128xf32>
    %85 = vector.shape_cast %84 : vector<1x1x128xf32> to vector<1x128xf32>
    %86 = vector.broadcast %85 : vector<1x128xf32> to vector<16x128xf32>
    %87 = arith.addf %83, %86 : vector<16x128xf32>
    %cst_57 = arith.constant 0.000000e+00 : f32
    %88 = vector.broadcast %cst_57 : f32 to vector<16x128xf32>
    %89 = arith.maximumf %87, %88 : vector<16x128xf32>
    %cst_58 = arith.constant dense<0.000000e+00> : vector<128xf32>
    %90 = vector.multi_reduction <add>, %79, %cst_58 [0] : vector<8x128xf32> to vector<128xf32>
    %91 = vector.shape_cast %90 : vector<128xf32> to vector<1x128xf32>
    %cst_59 = arith.constant 8.000000e+00 : f32
    %92 = vector.broadcast %cst_59 : f32 to vector<1x128xf32>
    %93 = arith.divf %91, %92 : vector<1x128xf32>
    %94 = vector.broadcast %93 : vector<1x128xf32> to vector<8x128xf32>
    %95 = arith.subf %79, %94 : vector<8x128xf32>
    %96 = arith.mulf %95, %95 : vector<8x128xf32>
    %cst_60 = arith.constant dense<0.000000e+00> : vector<128xf32>
    %97 = vector.multi_reduction <add>, %96, %cst_60 [0] : vector<8x128xf32> to vector<128xf32>
    %98 = vector.shape_cast %97 : vector<128xf32> to vector<1x128xf32>
    %cst_61 = arith.constant 8.000000e+00 : f32
    %99 = vector.broadcast %cst_61 : f32 to vector<1x128xf32>
    %100 = arith.divf %98, %99 : vector<1x128xf32>
    %101 = vector.broadcast %93 : vector<1x128xf32> to vector<8x128xf32>
    %102 = arith.subf %79, %101 : vector<8x128xf32>
    %cst_62 = arith.constant 9.99999974E-6 : f32
    %103 = vector.broadcast %cst_62 : f32 to vector<1x128xf32>
    %104 = arith.addf %100, %103 : vector<1x128xf32>
    %105 = math.rsqrt %104 : vector<1x128xf32>
    %106 = vector.broadcast %105 : vector<1x128xf32> to vector<8x128xf32>
    %107 = arith.mulf %102, %106 : vector<8x128xf32>
    %c1_63 = arith.constant 1 : index
    %c0_64 = arith.constant 0 : index
    %c0_65 = arith.constant 0 : index
    %108 = vector.load %arg9[%c1_63, %c0_64, %c0_65] : memref<2x1x128xf32, #tpu.memory_space<vmem>>, vector<1x1x128xf32>
    %109 = vector.shape_cast %108 : vector<1x1x128xf32> to vector<1x128xf32>
    %110 = vector.broadcast %109 : vector<1x128xf32> to vector<8x128xf32>
    %111 = arith.mulf %107, %110 : vector<8x128xf32>
    %c1_66 = arith.constant 1 : index
    %c0_67 = arith.constant 0 : index
    %c0_68 = arith.constant 0 : index
    %112 = vector.load %arg10[%c1_66, %c0_67, %c0_68] : memref<2x1x128xf32, #tpu.memory_space<vmem>>, vector<1x1x128xf32>
    %113 = vector.shape_cast %112 : vector<1x1x128xf32> to vector<1x128xf32>
    %114 = vector.broadcast %113 : vector<1x128xf32> to vector<8x128xf32>
    %115 = arith.addf %111, %114 : vector<8x128xf32>
    %116 = arith.truncf %115 : vector<8x128xf32> to vector<8x128xbf16>
    %cst_69 = arith.constant dense<0.000000e+00> : vector<16x128xf32>
    %117 = tpu.matmul %5, %116, %cst_69 {dimension_numbers = #tpu.dot_dimension_numbers<[1], [0], [0], [1], [0, 0, 1, 1], [], []>} : vector<16x8xbf16>, vector<8x128xbf16>, vector<16x128xf32> -> vector<16x128xf32>
    %118 = arith.addf %117, %89 : vector<16x128xf32>
    %cst_70 = arith.constant 0.000000e+00 : f32
    %119 = vector.broadcast %cst_70 : f32 to vector<16x128xf32>
    %120 = arith.maximumf %118, %119 : vector<16x128xf32>
    %121 = arith.truncf %120 : vector<16x128xf32> to vector<16x128xbf16>
    %cst_71 = arith.constant dense<0.000000e+00> : vector<8x128xf32>
    %122 = tpu.matmul %7, %121, %cst_71 {dimension_numbers = #tpu.dot_dimension_numbers<[1], [0], [0], [1], [0, 0, 1, 1], [], []>} : vector<8x16xbf16>, vector<16x128xbf16>, vector<8x128xf32> -> vector<8x128xf32>
    %123 = arith.addf %115, %122 : vector<8x128xf32>
    %124 = arith.truncf %123 : vector<8x128xf32> to vector<8x128xbf16>
    %c1_72 = arith.constant 1 : index
    %c0_73 = arith.constant 0 : index
    %c0_74 = arith.constant 0 : index
    %125 = vector.load %arg5[%c1_72, %c0_73, %c0_74] : memref<2x128x128xbf16, #tpu.memory_space<vmem>>, vector<1x128x128xbf16>
    %126 = vector.shape_cast %125 : vector<1x128x128xbf16> to vector<128x128xbf16>
    %cst_75 = arith.constant dense<0.000000e+00> : vector<8x128xf32>
    %127 = tpu.matmul %124, %126, %cst_75 {dimension_numbers = #tpu.dot_dimension_numbers<[1], [0], [0], [1], [0, 0, 1, 1], [], []>} : vector<8x128xbf16>, vector<128x128xbf16>, vector<8x128xf32> -> vector<8x128xf32>
    %c1_76 = arith.constant 1 : index
    %c0_77 = arith.constant 0 : index
    %c0_78 = arith.constant 0 : index
    %128 = vector.load %arg6[%c1_76, %c0_77, %c0_78] : memref<2x1x128xf32, #tpu.memory_space<vmem>>, vector<1x1x128xf32>
    %129 = vector.shape_cast %128 : vector<1x1x128xf32> to vector<1x128xf32>
    %130 = vector.broadcast %129 : vector<1x128xf32> to vector<8x128xf32>
    %131 = arith.addf %127, %130 : vector<8x128xf32>
    %cst_79 = arith.constant 0.000000e+00 : f32
    %132 = vector.broadcast %cst_79 : f32 to vector<8x128xf32>
    %133 = arith.maximumf %131, %132 : vector<8x128xf32>
    %134 = arith.addf %133, %1 : vector<8x128xf32>
    %c0_80 = arith.constant 0 : index
    %c0_81 = arith.constant 0 : index
    %c0_82 = arith.constant 0 : index
    %135 = vector.load %arg11[%c0_80, %c0_81, %c0_82] : memref<1x8x128xf32, #tpu.memory_space<vmem>>, vector<1x8x128xf32>
    %136 = vector.shape_cast %135 : vector<1x8x128xf32> to vector<8x128xf32>
    %137 = vector.shape_cast %134 : vector<8x128xf32> to vector<1x8x128xf32>
    tpu.vector_store %arg11[%c0_80, %c0_81, %c0_82], %137 {strides = array<i32>} : memref<1x8x128xf32, #tpu.memory_space<vmem>>, vector<1x8x128xf32>,
    return
  }
  func.func @transform_0(%arg0: i32) -> (i32, i32, i32) {
    %c0_i32 = arith.constant 0 : i32
    %c0_i32_0 = arith.constant 0 : i32
    %c0_i32_1 = arith.constant 0 : i32
    return %arg0, %c0_i32, %c0_i32_0 : i32, i32, i32
  }
  func.func @transform_1(%arg0: i32) -> (i32, i32, i32) {
    %c0_i32 = arith.constant 0 : i32
    %c0_i32_0 = arith.constant 0 : i32
    %c0_i32_1 = arith.constant 0 : i32
    return %arg0, %c0_i32, %c0_i32_0 : i32, i32, i32
  }
  func.func @transform_2(%arg0: i32) -> (i32, i32, i32) {
    %c0_i32 = arith.constant 0 : i32
    %c0_i32_0 = arith.constant 0 : i32
    %c0_i32_1 = arith.constant 0 : i32
    return %arg0, %c0_i32, %c0_i32_0 : i32, i32, i32
  }
  func.func @transform_3(%arg0: i32) -> (i32, i32, i32) {
    %c0_i32 = arith.constant 0 : i32
    %c0_i32_0 = arith.constant 0 : i32
    %c0_i32_1 = arith.constant 0 : i32
    return %arg0, %c0_i32, %c0_i32_0 : i32, i32, i32
  }
  func.func @transform_4(%arg0: i32) -> (i32, i32, i32) {
    %c0_i32 = arith.constant 0 : i32
    %c0_i32_0 = arith.constant 0 : i32
    %c0_i32_1 = arith.constant 0 : i32
    %c0_i32_2 = arith.constant 0 : i32
    return %c0_i32, %c0_i32_0, %c0_i32_1 : i32, i32, i32
  }
  func.func @transform_5(%arg0: i32) -> (i32, i32, i32) {
    %c0_i32 = arith.constant 0 : i32
    %c0_i32_0 = arith.constant 0 : i32
    %c0_i32_1 = arith.constant 0 : i32
    %c0_i32_2 = arith.constant 0 : i32
    return %c0_i32, %c0_i32_0, %c0_i32_1 : i32, i32, i32
  }
  func.func @transform_6(%arg0: i32) -> (i32, i32, i32) {
    %c0_i32 = arith.constant 0 : i32
    %c0_i32_0 = arith.constant 0 : i32
    %c0_i32_1 = arith.constant 0 : i32
    %c0_i32_2 = arith.constant 0 : i32
    return %c0_i32, %c0_i32_0, %c0_i32_1 : i32, i32, i32
  }
  func.func @transform_7(%arg0: i32) -> (i32, i32, i32) {
    %c0_i32 = arith.constant 0 : i32
    %c0_i32_0 = arith.constant 0 : i32
    %c0_i32_1 = arith.constant 0 : i32
    %c0_i32_2 = arith.constant 0 : i32
    return %c0_i32, %c0_i32_0, %c0_i32_1 : i32, i32, i32
  }
  func.func @transform_8(%arg0: i32) -> (i32, i32, i32) {
    %c0_i32 = arith.constant 0 : i32
    %c0_i32_0 = arith.constant 0 : i32
    %c0_i32_1 = arith.constant 0 : i32
    %c0_i32_2 = arith.constant 0 : i32
    return %c0_i32, %c0_i32_0, %c0_i32_1 : i32, i32, i32
  }
  func.func @transform_9(%arg0: i32) -> (i32, i32, i32) {
    %c0_i32 = arith.constant 0 : i32
    %c0_i32_0 = arith.constant 0 : i32
    %c0_i32_1 = arith.constant 0 : i32
    %c0_i32_2 = arith.constant 0 : i32
    return %c0_i32, %c0_i32_0, %c0_i32_1 : i32, i32, i32
  }
  func.func @transform_10(%arg0: i32) -> (i32, i32, i32) {
    %c0_i32 = arith.constant 0 : i32
    %c0_i32_0 = arith.constant 0 : i32
    %c0_i32_1 = arith.constant 0 : i32
    return %arg0, %c0_i32, %c0_i32_0 : i32, i32, i32
  }
}

</mosaic_0001>

<bundles_post_ra>
// kernel: tpu_custom_call.1
= control target key start
LH: loop header
LB: loop body
LE: loop exit
PB: predicated region body
PF: predicated region fallthrough
CT: control target
= control target key end

     0   :  { %s1911_s0 = inlined_call_operand.vmem [shape: f32[4,8,128], index: 0, kind: input, shape index: {}]   ;;  %s1912_s1 = inlined_call_operand.hbm [shape: f32[4,16,128], index: 1, kind: input, shape index: {}]   ;;  %s1913_s2 = inlined_call_operand.vmem [shape: bf16[4,16,8], index: 2, kind: input, shape index: {}]   ;;  %s1914_s3 = inlined_call_operand.vmem [shape: bf16[4,8,16], index: 3, kind: input, shape index: {}]   ;;  %s1915_s4 = inlined_call_operand.hbm [shape: bf16[2,128,128], index: 4, kind: input, shape index: {}]   ;;  %s1916_s5 = inlined_call_operand.vmem [shape: f32[2,1,128], index: 5, kind: input, shape index: {}]   ;;  %s1917_s6 = inlined_call_operand.hbm [shape: bf16[2,128,128], index: 6, kind: input, shape index: {}]   ;;  %s1918_s7 = inlined_call_operand.vmem [shape: f32[2,1,128], index: 7, kind: input, shape index: {}]   ;;  %s1919_s8 = inlined_call_operand.vmem [shape: f32[2,1,128], index: 8, kind: input, shape index: {}]   ;;  %s1920_s9 = inlined_call_operand.vmem [shape: f32[2,1,128], index: 9, kind: input, shape index: {}]   ;;  %s1921_s10 = inlined_call_operand.hbm [shape: f32[4,8,128], index: 10, kind: output, shape index: {}]  }
   0x1   :  { %1923 = sst [smem:[#allocation14_spill]] %s1915_s4 }
   0x2   :  { %1924 = sst [smem:[#allocation15_spill]] %s1917_s6 }
   0x3   :  { %15 = vsyncpa [#allocation3], 0 }
   0x4   :  { %17 = vsyncpa [#allocation3 + $0x1], 0 }
   0x5   :  { %18 = vsyncpa [#allocation6], 0 }
   0x6   :  { %19 = vsyncpa [#allocation4], 0 }
   0x7   :  { %21 = vsyncpa [#allocation4 + $0x1], 0  ;;  %s1684_s13 = smov 0   ;;  %s1686_s14 = smov 0  }
   0x8   :  { %s1688_s15 = smov 0   ;;  %s1690_s16 = smov 0  }
   0x9 LB: > { %1925 = sst [smem:[#allocation12_spill]] %s1616_s15  ;;  %s1705_s17 = sadd.s32 4294967295, %s1620_s16   ;;  %s1620_s16 = sphi %s1690_s16, %s1938_s16   ;;  %s1616_s15 = sphi %s1688_s15, %s1935_s15   ;;  %s1612_s14 = sphi %s1686_s14, %s1937_s14   ;;  %s1608_s13 = sphi %s1684_s13, %s1936_s13  }
   0xa   : > { %s1176_s18 = sadd.s32 4294967294, %s1620_s16   ;;  %p73_p0 = scmp.ne.s32.totalorder %s1612_s14, %s1608_s13 }
   0xb   : > { %p74_p1 = scmp.eq.s32.totalorder %s1705_s17, 0  ;;  %p275_p2 = scmp.eq.s32.totalorder %s1705_s17, 3 }
   0xc   : > { %p281_p3 = scmp.eq.s32.totalorder %s1176_s18, 3  ;;  %p1177_p5 = scmp.ge.s32.totalorder %s1620_s16, 1 }
   0xd   : > { %p1714_p4 = por %p74_p1, %p73_p0  ;;  %p288_p7 = scmp.lt.s32.totalorder %s1620_s16, 5 }
   0xe   : > { %p1719_p6 = por %p281_p3, %p73_p0  ;;  %s1928_s4 = sld [smem:[#allocation14_spill]] }
   0xf   : > { %p1727_p8 = pnand %p1177_p5, %p288_p7  ;;  %s1622_s25 = smov [#allocation5]  }
  0x10   : > { %s301_s26 = sshll.u32 %s1622_s25, 4  ;;  %s1930_s6 = sld [smem:[#allocation15_spill]]  ;;  %s302_s26 = int_to_ptr.vmem [resolvable:$true] %s301_s26 }
  0x11   : > { %p1386_p9 = pneg %p1727_p8  ;;  %s1623_s30 = smov 64  }
  0x12   : > { %s1624_s11 = smov 4   ;;  %s1625_s12 = smov [#allocation7]  }
  0x13   : > { %p1387_p10 = pnand %p1386_p9, %p74_p1  ;;  %s318_s18 = sshll.u32 %s1625_s12, 4  ;;  %s319_s18 = int_to_ptr.vmem [resolvable:$true] %s318_s18 }
  0x14   : > { %s299_s23 = sshll.u32 %s1928_s4, 4  ;;  %s1739_s21 = sadd.s32 1, %s1620_s16   ;;  %s300_s23 = int_to_ptr.hbm [resolvable:$true] %s299_s23 }
  0x15   : > { %1389 = dma.hbm_to_vmem [thread:$0]  (!%p1387_p10), %s300_s23, 2048, %s302_s26, [#allocation6], %s1623_s30, %s1623_s30, %s1624_s11  }
  0x16   : > { %s316_s29 = sshll.u32 %s1930_s6, 4  ;;  %s60_s22 = sadd.s32 1, %s1616_s15  ;;  %s317_s29 = int_to_ptr.hbm [resolvable:$true] %s316_s29 }
  0x17   : > { %1392 = dma.hbm_to_vmem [thread:$0]  (!%p1387_p10), %s317_s29, 2048, %s319_s18, [#allocation6], %s1623_s30, %s1623_s30, %s1624_s11  }
  0x18   : > { %s57_s25 = ssub.s32 %s1620_s16, %s1739_s21  ;;  %p67_p11 = scmp.ne.s32.totalorder %s1616_s15, %s1612_s14 }
  0x19   : > { %p58_p12 = scmp.eq.s32.totalorder %s57_s25, 0  ;;  %p68_p13 = scmp.eq.s32.totalorder %s1620_s16, 0 }
  0x1a   : > { %p1749_p0 = por %p275_p2, %p67_p11  ;;  %p1403_p3 = scmp.lt.s32.totalorder %s1620_s16, 4 }
  0x1b   : > { %s1755_s23 = scalar_select %p58_p12, %s1616_s15, %s60_s22  }
  0x1c   : > { %p69_p5 = por %p68_p13, %p67_p11  ;;  %s348_s26 = sand.u32 1, %s1616_s15  }
  0x1d   : > { %1932 = sst [smem:[#allocation13_spill]] %s1755_s23  ;;  %s1181_s28 = sshll.u32 %s348_s26, 4 }
  0x1e   : > { %s1339_s29 = sshll.u32 %s1620_s16, 4  ;;  %s352_s18 = scalar_lea.vmem [#allocation2], %s1181_s28 }
  0x1f   : > { %s357_s12 = scalar_lea.hbm %s1912_s1, %s1339_s29  ;;  %s360_s4 = sshll.u32 %s352_s18, 4  ;;  %s361_s4 = int_to_ptr.vmem [resolvable:$true] %s360_s4 }
  0x20   : > { %s358_s25 = sshll.u32 %s357_s12, 4  ;;  %p1762_p2 = pnand %p1403_p3, %p69_p5  ;;  %s359_s25 = int_to_ptr.hbm [resolvable:$true] %s358_s25 }
  0x21   : > { %s349_s22 = scalar_lea.sflag [#allocation3], %s348_s26  ;;  %s1520_s23 = sshra.s32 %s359_s25, 4  ;;  %s1521_s23 = int_to_ptr.hbm [resolvable:$true] %s1520_s23 }
  0x22   : > { %s1522_s15 = scalar_lea.hbm %s1521_s23, 16  ;;  %p1524_p9 = pneg %p1762_p2 }
  0x23   : > { %p1523_p7 = scmp.ne.s32.totalorder %s1521_s23, %s1522_s15  ;;  %s1527_s30 = scalar_lea.hbm %s1912_s1, 64 }
  0x24   : > { %p1528_p12 = scmp.lt.s32.totalorder %s1521_s23, %s1912_s1  ;;  %p1529_p13 = scmp.lt.s32.totalorder %s1527_s30, %s1522_s15 }
  0x25   : > { %p1525_p10 = pnand %p1524_p9, %p1523_p7 }
  0x26   : > { %p1530_p3 = por %p1529_p13, %p1528_p12 }
  0x27   : > { %p1526_p11 = pneg %p1525_p10 }
  0x29   : > { %p1531_p5 = pnand %p1530_p3, %p1526_p11 }
  0x2b   : > { %1534 = shalt.err (!%p1531_p5)
}
  0x2c   : > { %s1626_s26 = smov 128   ;;  %s1627_s18 = smov 8  }
  0x2d   : > { %1396 = dma.hbm_to_vmem [thread:$0]  (!%p1762_p2), %s359_s25, 256, %s361_s4, %s349_s22, %s1626_s26, %s1626_s26, %s1627_s18  }
  0x2e   : > { %387 = sbr.rel (%p1727_p8) target bundleno = 1434 (0x59a), region = 60  ;;  %s1779_s29 = sand.u32 (!%p1727_p8), 1, %s1612_s14  }
  0x2f   : > { %s1185_s28 = sshll.u32 (!%p1727_p8), %s1779_s29, 4  ;;  %s390_s23 = scalar_lea.sflag (!%p1727_p8), [#allocation3], %s1779_s29 }
  0x30   : > { %s1783_s15 = scalar_lea.vmem (!%p1727_p8), [#allocation2], %s1185_s28 }
  0x33   : > { %1595 = dma.done.wait (%p1714_p4), %s390_s23, 256  }
  0x34   : > { %1597 = vsyncadd (%p1714_p4), %s390_s23, 4294967040 }
  0x35   : > { %1599 = dma.done.wait (%p74_p1), [#allocation6], 4096  }
  0x36   : > { %1601 = vsyncadd (%p74_p1), [#allocation6], 4294963200  ;;  %p454_p8 = scmp.lt.s32.totalorder %s1705_s17, 3  ;;  %vm484_vm0 = vcmask 1043456   ;;  %vm480_vm1 = vcmask 64512   ;;  %v1349_v4 = vld [vmem:[#allocation5 + $0x38] sm:$0xff] }
  0x37   : > { %592 = vmatpush.bf16.msra.mxu2 %v1349_v4  ;;  %v1348_v5 = vld [vmem:[#allocation5 + $0x30] sm:$0xff]  ;;  %v1347_v6 = vld [vmem:[#allocation5 + $0x28] sm:$0xff]  ;;  %v1346_v7 = vld [vmem:[#allocation5 + $0x20] sm:$0xff]  ;;  %vm505_vm2 = vcmask 130048   ;;  %v1628_v27 = vmov 8.0   ;;  %s1570_s23 = scalar_lea.hbm %s1921_s10, 32 }
  0x38   : > { %s1795_s4 = scalar_select %p454_p8, %s1705_s17, 3  ;;  %v1345_v9 = vld [vmem:[#allocation5 + $0x18] sm:$0xff]  ;;  %v1814_v10 = vld [vmem:[%s1783_s15] sm:$0xff]  ;;  %v1343_v15 = vld [vmem:[#allocation5 + $0x8] sm:$0xff]  ;;  %1454 = vrcp.f32 %v1628_v27 }
  0x39   : > { %v1344_v11 = vld [vmem:[#allocation5 + $0x10] sm:$0xff]  ;;  %v470_v12 = vld [vmem:[%s1783_s15 + $0x8] sm:$0xff]  ;;  %v1342_v21 = vld [vmem:[#allocation5] sm:$0xff] }
  0x3a   : > { %s1189_s6 = sshll.u32 %s1795_s4, 3  ;;  %s1192_s12 = sshll.u32 %s1795_s4, 2  ;;  %v1357_v26 = vld [vmem:[#allocation7 + $0x38] sm:$0xff]  ;;  %v1356_v28 = vld [vmem:[#allocation7 + $0x30] sm:$0xff]  ;;  %v1355_v29 = vld [vmem:[#allocation7 + $0x28] sm:$0xff]  ;;  %v606_v53 = vpack.c.bf16 %v470_v12, %v1814_v10 }
  0x3b   : > { %s457_s22 = scalar_lea.vmem %s1911_s0, %s1189_s6  ;;  %s462_s11 = scalar_lea.vmem %s1913_s2, %s1189_s6  ;;  %593 = vmatpush.bf16.msra.mxu2 %v1348_v5  ;;  %675 = vmatpush.bf16.msra.mxu3 %v1357_v26  ;;  %v1446_v31 = vld [vmem:[%s1916_s5] ss:$0 sm:$0xff]  ;;  %v1353_v37 = vld [vmem:[#allocation7 + $0x18] sm:$0xff]  ;;  %v1352_v41 = vld [vmem:[#allocation7 + $0x10] sm:$0xff] }
  0x3c   : > { %v1801_v0 = vld [vmem:[%s457_s22] sm:$0xff]  ;;  %s466_s28 = scalar_lea.vmem %s1914_s3, %s1192_s12  ;;  %v1351_v46 = vld [vmem:[#allocation7 + $0x8] sm:$0xff]  ;;  %s1188_s4 = sshll.u32 %s1779_s29, 3 }
  0x3d   : > { %v474_v1 = vpack.c.bf16 %v1801_v0, %v1801_v0  ;;  %v1809_v3 = vld [vmem:[%s462_s11] sm:$0xff]  ;;  %s1336_s6 = sshll.u32 %s1705_s17, 3  ;;  %s453_s19 = scalar_lea.vmem [#allocation8], %s1188_s4 }
  0x3e   : > { %v1822_v20 = vld [vmem:[%s466_s28] sm:$0xf]  ;;  %v1455_v30 = vpop.eup %1454  ;;  %s1046_s22 = scalar_lea.hbm %s1921_s10, %s1336_s6  ;;  %s1048_s30 = sshll.u32 %s453_s19, 4  ;;  %s1049_s30 = int_to_ptr.vmem [resolvable:$true] %s1048_s30 }
  0x3f   : > { %v486_v2 = vsel %vm484_vm0, %v474_v1, 0  ;;  %594 = vmatpush.bf16.msra.mxu2 %v1347_v6  ;;  %676 = vmatpush.bf16.msra.mxu3 %v1356_v28  ;;  %v698_v32 = vmul.f32 8.0, %v1455_v30  ;;  %v1354_v33 = vld [vmem:[#allocation7 + $0x20] sm:$0xff]  ;;  %vm702_vm3 = vweird.f32 %v1455_v30  ;;  %s1050_s11 = sshll.u32 %s1046_s22, 4  ;;  %s1036_s12 = scalar_lea.sflag [#allocation4], %s1779_s29  ;;  %s1051_s11 = int_to_ptr.hbm [resolvable:$true] %s1050_s11 }
  0x40   : > { %495 = vmatpush.bf16.msra.mxu0 %v486_v2  ;;  %v1350_v50 = vld [vmem:[#allocation7] sm:$0xff]  ;;  %s1564_s17 = sshra.s32 %s1051_s11, 4  ;;  %s1565_s17 = int_to_ptr.hbm [resolvable:$true] %s1564_s17 }
  0x41   : > { %v699_v36 = vsub.f32 1.0, %v698_v32  ;;  %v1365_v32 = vld [vmem:[#allocation5 + $0x78] sm:$0xff]  ;;  %s1566_s26 = scalar_lea.hbm %s1565_s17, 8  ;;  %p1571_p7 = scmp.lt.s32.totalorder %s1565_s17, %s1921_s10 }
  0x42   : > { %p1567_p1 = scmp.ne.s32.totalorder %s1565_s17, %s1566_s26  ;;  %p1572_p9 = scmp.lt.s32.totalorder %s1570_s23, %s1566_s26 }
  0x43   : > { %1197 = vmatmul.msk.bf16.vlgmr.msra.gmra.mxu0 %vm480_vm1, %v1809_v3  ;;  %595 = vmatpush.bf16.msra.mxu2 %v1346_v7  ;;  %v700_v40 = vmul.f32 %v1455_v30, %v699_v36  ;;  %v1363_v36 = vld [vmem:[#allocation5 + $0x68] sm:$0xff] }
  0x44   : > { %677 = vmatpush.bf16.msra.mxu3 %v1355_v29  ;;  %p1568_p4 = pnand %p1567_p1, %p1749_p0  ;;  %p1573_p10 = por %p1572_p9, %p1571_p7 }
  0x45   : > { %v701_v45 = vadd.f32 %v1455_v30, %v700_v40  ;;  %v1361_v40 = vld [vmem:[#allocation5 + $0x58] sm:$0xff] }
  0x46   : > { %p1569_p2 = pneg %p1568_p4 }
  0x47   : > { %596 = vmatpush.bf16.msra.mxu2 %v1345_v9  ;;  %v1830_v49 = vsel %vm702_vm3, %v1455_v30, %v701_v45  ;;  %v1373_v30 = vld [vmem:[#allocation7 + $0x78] sm:$0xff]  ;;  %v1366_v45 = vld [vmem:[#allocation7 + $0x40] sm:$0xff] }
  0x48   : > { %678 = vmatpush.bf16.msra.mxu3 %v1354_v33  ;;  %v1372_v33 = vld [vmem:[#allocation7 + $0x70] sm:$0xff]  ;;  %p1574_p11 = pnand %p1573_p10, %p1569_p2 }
  0x4b   : > { %597 = vmatpush.bf16.msra.mxu2 %v1344_v11  ;;  %v1448_v11 = vld [vmem:[%s1920_s9] ss:$0 sm:$0xff] }
  0x4c   : > { %679 = vmatpush.bf16.msra.mxu3 %v1353_v37  ;;  %v1370_v37 = vld [vmem:[#allocation7 + $0x60] sm:$0xff] }
  0x4f   : > { %598 = vmatpush.bf16.msra.mxu2 %v1343_v15 }
  0x50   : > { %680 = vmatpush.bf16.msra.mxu3 %v1352_v41  ;;  %v1368_v41 = vld [vmem:[#allocation7 + $0x50] sm:$0xff] }
  0x53   : > { %599 = vmatpush.bf16.msra.mxu2 %v1342_v21 }
  0x54   : > { %681 = vmatpush.bf16.msra.mxu3 %v1351_v46 }
  0x57   : > { %1019 = vmatpush.bf16.msrb.mxu2 %v1365_v32 }
  0x58   : > { %682 = vmatpush.bf16.msra.mxu3 %v1350_v50 }
  0x5b   : > { %683 = vmatmul.bf16.vlgmr.msra.gmra.mxu3 %v606_v53  ;;  %v1857_v53 = vld [vmem:[%s1916_s5 + $0x1] ss:$0 sm:$0xff] }
  0xc0   : > { %v497_v8 = vpop.f32.mrf.mxu0 }
  0xc1   : > { %v498_v13 = vadd.f32 %v497_v8, %v1814_v10  ;;  %v1447_v8 = vld [vmem:[%s1919_s8] ss:$0 sm:$0xff] }
  0xc3   : > { %v502_v17 = vmax.f32 %v498_v13, 0.0 }
  0xc8   : > { %v499_v14 = vpop.f32.mrf.mxu0 }
  0xc9   : > { %v500_v16 = vadd.f32 %v499_v14, %v470_v12 }
  0xcb   : > { %v503_v18 = vmax.f32 %v500_v16, 0.0 }
  0xcd   : > { %v504_v19 = vpack.c.bf16 %v503_v18, %v502_v17  ;;  %v1449_v17 = vld [vmem:[%s1918_s7] ss:$0 sm:$0xff] }
  0xcf   : > { %516 = vmatpush.bf16.msra.mxu1 %v504_v19 }
  0xd2   : > { %1198 = vmatmul.msk.bf16.vlgmr.msra.gmra.mxu1 %vm505_vm2, %v1822_v20 }
  0xde   : > { %v684_v16 = vpop.f32.mrf.mxu3 }
  0xdf   : > { %v685_v18 = vadd.f32 %v1449_v17, %v684_v16 }
  0xe6   : > { %v686_v19 = vpop.f32.mrf.mxu3 }
 0x14f   : > { %v518_v22 = vpop.f32.mrf.mxu1 }
 0x150   : > { %v522_v23 = vadd.f32 %v518_v22, %v1801_v0  ;;  %v689_v22 = vmax.f32 %v685_v18, 0.0 }
 0x152   : > { %v523_v24 = vpack.c.bf16 %v522_v23, %v522_v23  ;;  %v687_v23 = vadd.f32 %v1449_v17, %v686_v19  ;;  %v1452_v19 = vld [vmem:[%s1919_s8 + $0x1] ss:$0 sm:$0xff] }
 0x154   : > { %600 = vmatmul.bf16.vlgmr.msra.gmra.mxu2 %v523_v24  ;;  %v690_v24 = vmax.f32 %v687_v23, 0.0 }
 0x156   : > { %v856_v46 = vpack.c.bf16 %v690_v24, %v689_v22 }
 0x157   : > { %v520_v25 = vpop.f32.mrf.mxu1 }
 0x1d7   : > { %v601_v34 = vpop.f32.mrf.mxu2 }
 0x1d8   : > { %v602_v35 = vadd.f32 %v1446_v31, %v601_v34  ;;  %v1364_v34 = vld [vmem:[#allocation5 + $0x70] sm:$0xff] }
 0x1d9   : > { %1020 = vmatpush.bf16.msrb.mxu2 %v1364_v34 }
 0x1da   : > { %v605_v38 = vmax.f32 %v602_v35, 0.0  ;;  %v1371_v35 = vld [vmem:[#allocation7 + $0x68] sm:$0xff] }
 0x1dc   : > { %v691_v39 = vrot.slane %v605_v38, 4 }
 0x1dd   : > { %1021 = vmatpush.bf16.msrb.mxu2 %v1363_v36 }
 0x1de   : > { %v692_v42 = vadd.f32 %v691_v39, %v605_v38  ;;  %v1369_v39 = vld [vmem:[#allocation7 + $0x58] sm:$0xff] }
 0x1df   : > { %v603_v43 = vpop.f32.mrf.mxu2 }
 0x1e0   : > { %v693_v44 = vrot.slane %v692_v42, 2  ;;  %v1367_v43 = vld [vmem:[#allocation7 + $0x48] sm:$0xff] }
 0x1e2   : > { %v694_v47 = vadd.f32 %v693_v44, %v692_v42  ;;  %v1360_v42 = vld [vmem:[#allocation5 + $0x50] sm:$0xff]  ;;  %v1359_v44 = vld [vmem:[#allocation5 + $0x48] sm:$0xff] }
 0x1e4   : > { %v695_v48 = vrot.slane %v694_v47, 1 }
 0x1e6   : > { %v696_v51 = vadd.f32 %v695_v48, %v694_v47  ;;  %v1358_v47 = vld [vmem:[#allocation5 + $0x40] sm:$0xff] }
 0x1e8   : > { %v704_v52 = vmul.f32 %v1830_v49, %v696_v51 }
 0x1ea   : > { %v705_v54 = vsub.f32 %v605_v38, %v704_v52  ;;  %v1362_v38 = vld [vmem:[#allocation5 + $0x60] sm:$0xff] }
 0x1eb   : > { %1022 = vmatpush.bf16.msrb.mxu2 %v1362_v38 }
 0x1ec   : > { %v706_v55 = vmul.f32 %v705_v54, %v705_v54 }
 0x1ee   : > { %v707_v56 = vrot.slane %v706_v55, 4 }
 0x1ef   : > { %1023 = vmatpush.bf16.msrb.mxu2 %v1361_v40 }
 0x1f0   : > { %v708_v57 = vadd.f32 %v707_v56, %v706_v55 }
 0x1f2   : > { %v709_v58 = vrot.slane %v708_v57, 2 }
 0x1f3   : > { %1024 = vmatpush.bf16.msrb.mxu2 %v1360_v42 }
 0x1f4   : > { %v710_v59 = vadd.f32 %v709_v58, %v708_v57 }
 0x1f6   : > { %v711_v60 = vrot.slane %v710_v59, 1 }
 0x1f7   : > { %1025 = vmatpush.bf16.msrb.mxu2 %v1359_v44 }
 0x1f8   : > { %v712_v61 = vadd.f32 %v711_v60, %v710_v59 }
 0x1fa   : > { %v713_v62 = vmul.f32 %v712_v61, %v1830_v49 }
 0x1fb   : > { %1026 = vmatpush.bf16.msrb.mxu2 %v1358_v47 }
 0x1fc   : > { %v714_v63 = vadd.f32 1e-05, %v713_v62 }
 0x1fe   : > { %1456 = vrsqrt.f32 %v714_v63  ;;  %vm721_vm5 = vweird.f32 %v714_v63 }
 0x204   : > { %v1457_v1 = vpop.eup %1456 }
 0x205   : > { %v716_v2 = vmul.f32 %v1457_v1, %v714_v63  ;;  %vm722_vm4 = vweird.f32 %v1457_v1 }
 0x206   : > { %vm723_vm6 = vmor %vm721_vm5, %vm722_vm4 }
 0x207   : > { %v717_v4 = vmul.f32 %v1457_v1, %v716_v2 }
 0x209   : > { %v718_v5 = vmul.f32 0.5, %v717_v4 }
 0x20b   : > { %v719_v6 = vsub.f32 1.5, %v718_v5 }
 0x20d   : > { %v720_v7 = vmul.f32 %v1457_v1, %v719_v6 }
 0x20f   : > { %v724_v9 = vsel %vm723_vm6, %v1457_v1, %v720_v7 }
 0x210   : > { %v725_v10 = vmul.f32 %v724_v9, %v705_v54 }
 0x212   : > { %v730_v12 = vmul.f32 %v1447_v8, %v725_v10 }
 0x214   : > { %v1841_v13 = vadd.f32 %v1448_v11, %v730_v12 }
 0x216   : > { %v736_v14 = vpack.c.bf16 %v1841_v13, %v1841_v13 }
 0x218   : > { %v738_v15 = vsel %vm484_vm0, %v736_v14, 0 }
 0x219   : > { %747 = vmatpush.bf16.msrb.mxu0 %v738_v15 }
 0x21c   : > { %1263 = vmatmul.msk.bf16.vlgmr.msrb.gmra.mxu0 %vm480_vm1, %v1809_v3 }
 0x21d   : > { %842 = vmatpush.bf16.msra.mxu0 %v1365_v32 }
 0x221   : > { %843 = vmatpush.bf16.msra.mxu0 %v1364_v34 }
 0x225   : > { %844 = vmatpush.bf16.msra.mxu0 %v1363_v36 }
 0x229   : > { %845 = vmatpush.bf16.msra.mxu0 %v1362_v38 }
 0x22d   : > { %846 = vmatpush.bf16.msra.mxu0 %v1361_v40 }
 0x231   : > { %847 = vmatpush.bf16.msra.mxu0 %v1360_v42 }
 0x235   : > { %848 = vmatpush.bf16.msra.mxu0 %v1359_v44 }
 0x239   : > { %849 = vmatpush.bf16.msra.mxu0 %v1358_v47 }
 0x299   : > { %v749_v21 = vpop.f32.mrf.mxu0 }
 0x29a   : > { %v750_v25 = vadd.f32 %v749_v21, %v689_v22 }
 0x29c   : > { %v754_v28 = vmax.f32 %v750_v25, 0.0 }
 0x2a1   : > { %v751_v26 = vpop.f32.mrf.mxu0 }
 0x2a2   : > { %v752_v27 = vadd.f32 %v751_v26, %v690_v24 }
 0x2a4   : > { %v755_v29 = vmax.f32 %v752_v27, 0.0 }
 0x2a6   : > { %v756_v31 = vpack.c.bf16 %v755_v29, %v754_v28  ;;  %v1450_v28 = vld [vmem:[%s1918_s7 + $0x1] ss:$0 sm:$0xff] }
 0x2a8   : > { %764 = vmatpush.bf16.msrb.mxu1 %v756_v31 }
 0x2ab   : > { %1264 = vmatmul.msk.bf16.vlgmr.msrb.gmra.mxu1 %vm505_vm2, %v1822_v20 }
 0x2ac   : > { %927 = vmatpush.bf16.msra.mxu1 %v1373_v30 }
 0x2b0   : > { %928 = vmatpush.bf16.msra.mxu1 %v1372_v33 }
 0x2b4   : > { %929 = vmatpush.bf16.msra.mxu1 %v1371_v35 }
 0x2b8   : > { %930 = vmatpush.bf16.msra.mxu1 %v1370_v37 }
 0x2bc   : > { %931 = vmatpush.bf16.msra.mxu1 %v1369_v39 }
 0x2c0   : > { %932 = vmatpush.bf16.msra.mxu1 %v1368_v41 }
 0x2c4   : > { %933 = vmatpush.bf16.msra.mxu1 %v1367_v43 }
 0x2c8   : > { %934 = vmatpush.bf16.msra.mxu1 %v1366_v45 }
 0x2cb   : > { %935 = vmatmul.bf16.vlgmr.msra.gmra.mxu1 %v856_v46 }
 0x328   : > { %v766_v48 = vpop.f32.mrf.mxu1 }
 0x329   : > { %v770_v50 = vadd.f32 %v766_v48, %v1841_v13 }
 0x32b   : > { %v771_v51 = vpack.c.bf16 %v770_v50, %v770_v50 }
 0x32d   : > { %850 = vmatmul.bf16.vlgmr.msra.gmra.mxu0 %v771_v51 }
 0x330   : > { %v768_v52 = vpop.f32.mrf.mxu1 }
 0x348   : > { %v936_v27 = vpop.f32.mrf.mxu1 }
 0x349   : > { %v937_v31 = vadd.f32 %v1450_v28, %v936_v27 }
 0x34b   : > { %v941_v33 = vmax.f32 %v937_v31, 0.0 }
 0x350   : > { %v938_v29 = vpop.f32.mrf.mxu1 }
 0x351   : > { %v939_v32 = vadd.f32 %v1450_v28, %v938_v29 }
 0x353   : > { %v942_v34 = vmax.f32 %v939_v32, 0.0 }
 0x3aa   : > { %v851_v54 = vpop.f32.mrf.mxu0 }
 0x3ab   : > { %v852_v55 = vadd.f32 %v1857_v53, %v851_v54 }
 0x3ad   : > { %v855_v56 = vmax.f32 %v852_v55, 0.0 }
 0x3af   : > { %v943_v57 = vrot.slane %v855_v56, 4 }
 0x3b1   : > { %v944_v58 = vadd.f32 %v943_v57, %v855_v56 }
 0x3b2   : > { %v853_v59 = vpop.f32.mrf.mxu0 }
 0x3b3   : > { %v945_v60 = vrot.slane %v944_v58, 2 }
 0x3b5   : > { %v946_v61 = vadd.f32 %v945_v60, %v944_v58 }
 0x3b7   : > { %v947_v62 = vrot.slane %v946_v61, 1 }
 0x3b9   : > { %v948_v63 = vadd.f32 %v947_v62, %v946_v61 }
 0x3bb   : > { %v949_v1 = vmul.f32 %v948_v63, %v1830_v49 }
 0x3bd   : > { %v950_v2 = vsub.f32 %v855_v56, %v949_v1 }
 0x3bf   : > { %v951_v4 = vmul.f32 %v950_v2, %v950_v2 }
 0x3c1   : > { %v952_v5 = vrot.slane %v951_v4, 4 }
 0x3c3   : > { %v953_v6 = vadd.f32 %v952_v5, %v951_v4 }
 0x3c5   : > { %v954_v7 = vrot.slane %v953_v6, 2 }
 0x3c7   : > { %v955_v8 = vadd.f32 %v954_v7, %v953_v6 }
 0x3c9   : > { %v956_v9 = vrot.slane %v955_v8, 1 }
 0x3cb   : > { %v957_v10 = vadd.f32 %v956_v9, %v955_v8 }
 0x3cd   : > { %v958_v11 = vmul.f32 %v957_v10, %v1830_v49  ;;  %v1453_v49 = vld [vmem:[%s1920_s9 + $0x1] ss:$0 sm:$0xff] }
 0x3cf   : > { %v959_v12 = vadd.f32 1e-05, %v958_v11 }
 0x3d1   : > { %1458 = vrsqrt.f32 %v959_v12  ;;  %vm966_vm8 = vweird.f32 %v959_v12 }
 0x3d7   : > { %v1459_v13 = vpop.eup %1458 }
 0x3d8   : > { %v961_v14 = vmul.f32 %v1459_v13, %v959_v12  ;;  %vm967_vm7 = vweird.f32 %v1459_v13 }
 0x3d9   : > { %vm968_vm9 = vmor %vm966_vm8, %vm967_vm7 }
 0x3da   : > { %v962_v15 = vmul.f32 %v1459_v13, %v961_v14 }
 0x3dc   : > { %v963_v16 = vmul.f32 0.5, %v962_v15 }
 0x3de   : > { %v964_v17 = vsub.f32 1.5, %v963_v16 }
 0x3e0   : > { %v965_v18 = vmul.f32 %v1459_v13, %v964_v17 }
 0x3e2   : > { %v969_v21 = vsel %vm968_vm9, %v1459_v13, %v965_v18 }
 0x3e3   : > { %v970_v22 = vmul.f32 %v969_v21, %v950_v2 }
 0x3e5   : > { %v976_v23 = vmul.f32 %v1452_v19, %v970_v22 }
 0x3e7   : > { %v982_v24 = vadd.f32 %v1453_v49, %v976_v23 }
 0x3e9   : > { %v983_v25 = vpack.c.bf16 %v982_v24, %v982_v24 }
 0x3eb   : > { %v985_v26 = vsel %vm484_vm0, %v983_v25, 0 }
 0x3ec   : > { %994 = vmatpush.bf16.msrb.mxu3 %v985_v26 }
 0x3ef   : > { %1333 = vmatmul.msk.bf16.vlgmr.msrb.gmra.mxu3 %vm480_vm1, %v1809_v3 }
 0x472   : > { %v996_v30 = vpop.f32.mrf.mxu3 }
 0x473   : > { %v997_v35 = vadd.f32 %v996_v30, %v941_v33 }
 0x475   : > { %v1001_v38 = vmax.f32 %v997_v35, 0.0 }
 0x47a   : > { %v998_v36 = vpop.f32.mrf.mxu3 }
 0x47b   : > { %v999_v37 = vadd.f32 %v998_v36, %v942_v34 }
 0x47d   : > { %v1002_v39 = vmax.f32 %v999_v37, 0.0 }
 0x47f   : > { %v1003_v40 = vpack.c.bf16 %v1002_v39, %v1001_v38 }
 0x481   : > { %1011 = vmatpush.bf16.msra.mxu3 %v1003_v40 }
 0x484   : > { %1334 = vmatmul.msk.bf16.vlgmr.msra.gmra.mxu3 %vm505_vm2, %v1822_v20 }
 0x507   : > { %v1013_v3 = vpop.f32.mrf.mxu3 }
 0x508   : > { %v1017_v41 = vadd.f32 %v1013_v3, %v982_v24 }
 0x50a   : > { %v1018_v42 = vpack.c.bf16 %v1017_v41, %v1017_v41 }
 0x50c   : > { %1027 = vmatmul.bf16.vlgmr.msrb.gmra.mxu2 %v1018_v42 }
 0x50f   : > { %v1015_v43 = vpop.f32.mrf.mxu3 }
 0x58f   : > { %v1028_v44 = vpop.f32.mrf.mxu2 }
 0x590   : > { %v1029_v45 = vadd.f32 %v1857_v53, %v1028_v44 }
 0x592   : > { %v1032_v20 = vmax.f32 %v1029_v45, 0.0 }
 0x594   : > { %v1033_v46 = vadd.f32 %v1032_v20, %v1801_v0 }
 0x596   : > { %1034 = vst [vmem:[%s453_s19] sm:$0xff] %v1033_v46 }
 0x597   : > { %v1030_v47 = vpop.f32.mrf.mxu2 }
 0x598   : > { %1577 = shalt.err (!%p1574_p11)
}
 0x599   : > { %1384 = dma.vmem_to_hbm [thread:$0]  (%p1749_p0), %s1049_s30, 128, %s1051_s11, %s1036_s12  }
 0x59a PF: > { %p1406_p12 = scmp.ge.s32.totalorder %s1620_s16, 2  ;;  %s1062_s29 = sand.u32 1, %s1608_s13  }
 0x59b   : > { %s1063_s6 = scalar_lea.sflag [#allocation4], %s1062_s29 }
 0x59c   : > { %p1398_p13 = pnand %p1406_p12, %p1719_p6 }
 0x59e   : > { %p1399_p3 = pneg %p1398_p13 }
 0x5a0   : > { %1603 = dma.done.wait (%p1399_p3), %s1063_s6, 128  }
 0x5a1   : > { %1605 = vsyncadd (%p1399_p3), %s1063_s6, 4294967168  ;;  %s1934_s24 = sld [smem:[#allocation12_spill]]  ;;  %p24_p5 = scmp.ge.s32.totalorder %s1739_s21, 6  }
 0x5a2   : > { %s1935_s15 = sld [smem:[#allocation13_spill]]  ;;  %s1936_s13 = smov %s1612_s14 }
 0x5a3   : > { %s1938_s16 = smov %s1739_s21  ;;  %26 = sbr.rel (!%p24_p5) target bundleno = 9 (0x9), region = 128 }
 0x5a7   : > { %s1937_s14 = smov %s1934_s24 }
 0x5a8   :  { %1069 = vsyncpa [#allocation3], 1 }
 0x5a9   :  { %1071 = vsyncpa [#allocation3 + $0x1], 1 }
 0x5aa   :  { %1072 = vsyncpa [#allocation6], 1 }
 0x5ab   :  { %1073 = vsyncpa [#allocation4], 1 }
 0x5ac   :  { %1075 = vsyncpa [#allocation4 + $0x1], 1 }

</bundles_post_ra>
